<compile_context>
chip_gen: v5e
topology: v5e:2x2
jax: 0.10.0
libtpu: 0.0.40
codegen_flags: <defaults>
</compile_context>

<pallas_src>
from collections import namedtuple

import jax
import jax.numpy as jnp
import numpy as np
from jax import lax
from jax.experimental import pallas as pl
from jax.experimental.pallas import tpu as pltpu

LANES = 128
SUBLANES = 8
CHUNK_ROWS = 512                      # in-kernel sub-tile (bounds Mosaic temporaries)
TILE_BYTES = 4 * 1024 * 1024          # ~4 MiB per input pipeline buffer
MIN_ROWS_PER_CORE = 1024              # v7x only: 0.5 MiB/input/core before splitting
VMEM_LIMIT_BYTES = 32 * 1024 * 1024   # explicit: v5e scoped default is only 16 MiB


# ------------------------------ planning ----------------------------------- #

_Plan = namedtuple(
    "_Plan",
    "partitions steps tile_rows rows_total chunk_rows n_chunks needs_mask total_blocks")


def _round_up(x, m):
    return ((x + m - 1) // m) * m


def _num_tensorcores():
    """v7x has 2 TensorCores per chip; v5e/v6e have 1.  Default to 1 elsewhere."""
    try:
        kind = jax.devices()[0].device_kind.lower()
    except Exception:
        return 1
    return 2 if "v7" in kind else 1


def _row_alignment(*dtypes):
    """Sublane alignment of the tile: 8 rows for f32, 16 for bf16, 32 for 8-bit."""
    align = SUBLANES
    for dt in dtypes:
        itemsize = jnp.dtype(dt).itemsize
        align = max(align, SUBLANES * max(1, 4 // itemsize))
    return align


def _plan(n_elems, *dtypes):
    """Static plan for a flat streaming reduction of `n_elems` elements."""
    align = _row_alignment(*dtypes)
    max_itemsize = max(jnp.dtype(dt).itemsize for dt in dtypes)
    rows_needed = pl.cdiv(n_elems, LANES)

    if n_elems % LANES == 0:
        rows_total = rows_needed                     # zero-copy reshape path
    else:
        rows_total = max(align, _round_up(rows_needed, align))  # tiny tail-pad path

    partitions = _num_tensorcores()
    if rows_total < partitions * MIN_ROWS_PER_CORE:
        partitions = 1                               # not worth splitting across TCs
    rows_per_part = pl.cdiv(rows_total, partitions)

    # Byte-budgeted tile (~4 MiB/input/buffer), multiple of CHUNK_ROWS.
    max_tile_rows = max(CHUNK_ROWS,
                        (TILE_BYTES // (LANES * max_itemsize)) // CHUNK_ROWS * CHUNK_ROWS)

    if rows_per_part <= CHUNK_ROWS:
        tile_rows = _round_up(rows_per_part, align)
        steps = 1
        chunk_rows = tile_rows
        n_chunks = 1
    else:
        # Balance: pick step count first, then the tile size (CHUNK-aligned).
        steps = pl.cdiv(rows_per_part, max_tile_rows)
        tile_rows = min(max_tile_rows,
                        _round_up(pl.cdiv(rows_per_part, steps), CHUNK_ROWS))
        chunk_rows = CHUNK_ROWS
        n_chunks = tile_rows // CHUNK_ROWS

    total_blocks = pl.cdiv(rows_total, tile_rows)            # last valid block index + 1
    needs_mask = (partitions * steps * tile_rows) != rows_total
    return _Plan(partitions, steps, tile_rows, rows_total,
                 chunk_rows, n_chunks, needs_mask, total_blocks)


def _as_slab(x, rows_total):
    """Lane-dense (rows_total, 128) view.  Free (no copy) when n % 128 == 0."""
    flat = x.reshape(-1)                              # contiguous reshape: free
    pad = rows_total * LANES - flat.size
    if pad:
        flat = jnp.pad(flat, (0, pad))                # rare ragged-lane fallback
    return flat.reshape(rows_total, LANES)            # contiguous reshape: free


# ----------------------------- Pallas reduction ----------------------------- #

def _sq_diff(vals):
    d = vals[0] - vals[1]
    return d * d


def _identity(vals):
    return vals[0]


def _partial_sum(slabs, combine, plan):
    """sum(combine(slabs)) over all valid elements, via a streaming Pallas kernel."""
    (partitions, steps, tile_rows, rows_total,
     chunk_rows, n_chunks, needs_mask, total_blocks) = plan
    n_in = len(slabs)

    def body(in_refs, o_ref):
        p = pl.program_id(0)
        s = pl.program_id(1)

        @pl.when(s == 0)
        def _():
            o_ref[...] = jnp.zeros_like(o_ref)

        # Nominal (unclamped) global row of this block's first row.  Used both
        # for the edge test and the mask, so clamped duplicate blocks mask to 0.
        base_row = (p * steps + s) * tile_rows

        def chunk_partial(r0, masked):
            vals = combine([r[pl.ds(r0, chunk_rows), :].astype(jnp.float32)
                            for r in in_refs])
            if masked:
                row = (base_row + r0
                       + lax.broadcasted_iota(jnp.int32, (chunk_rows, LANES), 0))
                vals = jnp.where(row < rows_total, vals, 0.0)
            # Fold (chunk,128) -> (chunk//8, 8, 128) -> (8,128): layout-preserving
            # reshape + vreg-wise VPU adds; no per-chunk cross-lane XLU reduce.
            return vals.reshape(-1, SUBLANES, LANES).sum(axis=0)

        def accumulate(masked):
            if n_chunks == 1:
                acc = chunk_partial(0, masked)
            else:
                acc = lax.fori_loop(
                    0, n_chunks,
                    lambda c, a: a + chunk_partial(
                        pl.multiple_of(c * chunk_rows, chunk_rows), masked),
                    jnp.zeros((SUBLANES, LANES), jnp.float32),
                    unroll=(n_chunks <= 8))
            o_ref[...] += acc

        if needs_mask:
            is_edge = (base_row + tile_rows) > rows_total

            @pl.when(is_edge)
            def _():
                accumulate(True)

            @pl.when(jnp.logical_not(is_edge))
            def _():
                accumulate(False)
        else:
            accumulate(False)

    if n_in == 1:
        def kernel(a_ref, o_ref):
            body((a_ref,), o_ref)
    else:
        def kernel(a_ref, b_ref, o_ref):
            body((a_ref, b_ref), o_ref)

    def block_index(p, s):
        # Clamp so a (rare) fully out-of-range grid point re-reads the last valid
        # block; its contribution is zeroed by the nominal-index mask above.
        return (jnp.minimum(p * steps + s, total_blocks - 1), 0)

    partials = pl.pallas_call(
        kernel,
        out_shape=jax.ShapeDtypeStruct((partitions * SUBLANES, LANES), jnp.float32),
        grid_spec=pltpu.PrefetchScalarGridSpec(
            num_scalar_prefetch=0,
            grid=(partitions, steps),
            in_specs=[pl.BlockSpec((tile_rows, LANES), block_index) for _ in slabs],
            out_specs=pl.BlockSpec((SUBLANES, LANES), lambda p, s: (p, 0)),
        ),
        compiler_params=pltpu.CompilerParams(
            dimension_semantics=("parallel", "arbitrary"),
            vmem_limit_bytes=VMEM_LIMIT_BYTES),
    )(*slabs)
    # Tiny finish (fused under jit): sum <= partitions*1024 partials.
    return jnp.sum(partials)


# ------------------------------ loss wrappers ------------------------------ #

@jax.jit
def pallas_mse_loss(x, y):
    """mean((x - y)**2) over all elements; bulk reduction done inside the kernel."""
    if x.shape != y.shape:
        raise ValueError("input/target shape mismatch")
    n = int(np.prod(x.shape)) if x.ndim else 1
    if n == 0:
        return jnp.float32(float("nan"))      # matches torch mean-over-empty
    plan = _plan(n, x.dtype, y.dtype)
    xs = _as_slab(x, plan.rows_total)
    ys = _as_slab(y, plan.rows_total)
    total = _partial_sum([xs, ys], _sq_diff, plan)
    return total * jnp.float32(1.0 / n)


@jax.jit
def pallas_mean_loss(x):
    """mean(x) over all elements; bulk reduction done inside the kernel."""
    n = int(np.prod(x.shape)) if x.ndim else 1
    if n == 0:
        return jnp.float32(float("nan"))
    plan = _plan(n, x.dtype)
    xs = _as_slab(x, plan.rows_total)
    total = _partial_sum([xs], _identity, plan)
    return total * jnp.float32(1.0 / n)


# ------------------------------ KeySelector -------------------------------- #

class KeySelector:
    """JAX port of the PyTorch KeySelector wrapper (identical __init__ semantics)."""

    def __init__(self, *args, **kwargs):
        arg_names = ['input', 'target', 'loss']
        required_arg_names = ['input', 'loss']
        for name in arg_names:
            setattr(self, name, None)
        if len(args) + len(kwargs) <= len(required_arg_names):
            arg_names = required_arg_names
        args_set = []
        for name, value in zip(arg_names, args):
            setattr(self, name, value)
            args_set += [name]
        for name, value in kwargs.items():
            if name in arg_names and name not in args_set:
                setattr(self, name, value)
            else:
                raise TypeError(
                    f"__init__() got an unexpected keyword argument '{name}'")
        not_set_args = [n for n in required_arg_names if n not in args_set]
        if len(not_set_args) > 0:
            raise TypeError(
                f"__init__() missing {len(not_set_args)} required positional "
                f"argument{'s' if len(not_set_args) > 1 else ''}: '"
                + "', '".join(not_set_args) + "'")

    def __call__(self, container):
        return self.forward(container)

    def forward(self, container):
        if self.target is None:
            return self.loss(container[self.input])
        return self.loss(container[self.input], container[self.target])


# --------------------------------- demo ------------------------------------ #

if __name__ == "__main__":
    key = jax.random.PRNGKey(0)
    k1, k2, k3, k4, k5, k6 = jax.random.split(key, 6)

    # NCHW inputs, small shapes: batch=2, channels=4, spatial=16x16.
    pred = jax.random.normal(k1, (2, 4, 16, 16), dtype=jnp.float32)
    target = jax.random.normal(k2, (2, 4, 16, 16), dtype=jnp.float32)
    container = {"pred": pred, "target": target}

    # Two-key branch (all-positional, as required by the original __init__ logic).
    sel_mse = KeySelector("pred", "target", pallas_mse_loss)
    mse_out = jax.block_until_ready(sel_mse(container))
    mse_ref = jnp.mean((pred - target) ** 2)
    np.testing.assert_allclose(np.asarray(mse_out), np.asarray(mse_ref),
                               rtol=1e-5, atol=1e-5)

    # Single-key branch (target stays None).
    sel_mean = KeySelector("pred", pallas_mean_loss)
    mean_out = jax.block_until_ready(sel_mean(container))
    mean_ref = jnp.mean(pred)
    np.testing.assert_allclose(np.asarray(mean_out), np.asarray(mean_ref),
                               rtol=1e-5, atol=1e-5)

    # Odd shape (3*5*7*11 = 1155, not a multiple of 128): tiny tail-pad fallback.
    pred_odd = jax.random.normal(k3, (3, 5, 7, 11), dtype=jnp.float32)
    tgt_odd = jax.random.normal(k4, (3, 5, 7, 11), dtype=jnp.float32)
    odd_out = jax.block_until_ready(sel_mse({"pred": pred_odd, "target": tgt_odd}))
    odd_ref = jnp.mean((pred_odd - tgt_odd) ** 2)
    np.testing.assert_allclose(np.asarray(odd_out), np.asarray(odd_ref),
                               rtol=1e-5, atol=1e-5)

    # Multiple-of-128 element count with ragged rows (768 rows -> 1024-row tile):
    # exercises the zero-copy path, the clipped edge block, the in-kernel
    # iota/where mask and the multi-chunk fori_loop accumulation.
    pred_mid = jax.random.normal(k5, (2, 4, 96, 128), dtype=jnp.float32)
    tgt_mid = jax.random.normal(k6, (2, 4, 96, 128), dtype=jnp.float32)
    mid_out = jax.block_until_ready(sel_mse({"pred": pred_mid, "target": tgt_mid}))
    mid_ref = jnp.mean((pred_mid - tgt_mid) ** 2)
    np.testing.assert_allclose(np.asarray(mid_out), np.asarray(mid_ref),
                               rtol=1e-5, atol=1e-5)

    print("KERNEL_OK")
</pallas_src>

<mosaic_0001>
module attributes {stable_mosaic.version = 11 : i64} {
  func.func @kernel(%arg0: i32, %arg1: i32, %arg2: memref<16x128xf32, #tpu.memory_space<vmem>>, %arg3: memref<16x128xf32, #tpu.memory_space<vmem>>, %arg4: memref<8x128xf32, #tpu.memory_space<vmem>>) attributes {dimension_semantics = [#tpu.dimension_semantics<parallel>, #tpu.dimension_semantics<arbitrary>], iteration_bounds = array<i64: 1, 1>, scalar_prefetch = 0 : i64, scratch_operands = 0 : i64, tpu.core_type = #tpu.core_type<tc>, window_params = [{transform_indices = @transform_0, window_bounds = array<i64: 16, 128>}, {transform_indices = @transform_1, window_bounds = array<i64: 16, 128>}, {transform_indices = @transform_2, window_bounds = array<i64: 8, 128>}]} {
    %c0_i32 = arith.constant 0 : i32
    %0 = arith.cmpi eq, %arg1, %c0_i32 : i32
    %1 = arith.extui %0 : i1 to i32
    %c0_i32_0 = arith.constant 0 : i32
    %2 = arith.cmpi ne, %1, %c0_i32_0 : i32
    scf.if %2 {
      %cst_8 = arith.constant 0.000000e+00 : f32
      %12 = vector.broadcast %cst_8 : f32 to vector<8x128xf32>
      %c0_9 = arith.constant 0 : index
      %c0_10 = arith.constant 0 : index
      %13 = vector.load %arg4[%c0_9, %c0_10] : memref<8x128xf32, #tpu.memory_space<vmem>>, vector<8x128xf32>
      tpu.vector_store %arg4[%c0_9, %c0_10], %12 {strides = array<i32>} : memref<8x128xf32, #tpu.memory_space<vmem>>, vector<8x128xf32>,
    } else {
    }
    %c0 = arith.constant 0 : index
    %c0_1 = arith.constant 0 : index
    %3 = vector.load %arg2[%c0, %c0_1] : memref<16x128xf32, #tpu.memory_space<vmem>>, vector<16x128xf32>
    %c0_2 = arith.constant 0 : index
    %c0_3 = arith.constant 0 : index
    %4 = vector.load %arg3[%c0_2, %c0_3] : memref<16x128xf32, #tpu.memory_space<vmem>>, vector<16x128xf32>
    %5 = arith.subf %3, %4 : vector<16x128xf32>
    %6 = arith.mulf %5, %5 : vector<16x128xf32>
    %7 = vector.shape_cast %6 : vector<16x128xf32> to vector<2x8x128xf32>
    %cst = arith.constant dense<0.000000e+00> : vector<8x128xf32>
    %8 = vector.multi_reduction <add>, %7, %cst [0] : vector<2x8x128xf32> to vector<8x128xf32>
    %c0_4 = arith.constant 0 : index
    %c0_5 = arith.constant 0 : index
    %9 = vector.load %arg4[%c0_4, %c0_5] : memref<8x128xf32, #tpu.memory_space<vmem>>, vector<8x128xf32>
    %10 = arith.addf %9, %8 : vector<8x128xf32>
    %c0_6 = arith.constant 0 : index
    %c0_7 = arith.constant 0 : index
    %11 = vector.load %arg4[%c0_6, %c0_7] : memref<8x128xf32, #tpu.memory_space<vmem>>, vector<8x128xf32>
    tpu.vector_store %arg4[%c0_6, %c0_7], %10 {strides = array<i32>} : memref<8x128xf32, #tpu.memory_space<vmem>>, vector<8x128xf32>,
    return
  }
  func.func @transform_0(%arg0: i32, %arg1: i32) -> (i32, i32) {
    %c1_i32 = arith.constant 1 : i32
    %0 = arith.muli %arg0, %c1_i32 : i32
    %1 = arith.addi %0, %arg1 : i32
    %c0_i32 = arith.constant 0 : i32
    %2 = arith.minsi %1, %c0_i32 : i32
    %c0_i32_0 = arith.constant 0 : i32
    %c0_i32_1 = arith.constant 0 : i32
    return %2, %c0_i32_0 : i32, i32
  }
  func.func @transform_1(%arg0: i32, %arg1: i32) -> (i32, i32) {
    %c1_i32 = arith.constant 1 : i32
    %0 = arith.muli %arg0, %c1_i32 : i32
    %1 = arith.addi %0, %arg1 : i32
    %c0_i32 = arith.constant 0 : i32
    %2 = arith.minsi %1, %c0_i32 : i32
    %c0_i32_0 = arith.constant 0 : i32
    %c0_i32_1 = arith.constant 0 : i32
    return %2, %c0_i32_0 : i32, i32
  }
  func.func @transform_2(%arg0: i32, %arg1: i32) -> (i32, i32) {
    %c0_i32 = arith.constant 0 : i32
    %c0_i32_0 = arith.constant 0 : i32
    return %arg0, %c0_i32 : i32, i32
  }
}

</mosaic_0001>

<bundles_post_ra>
// kernel: pallas_mse_loss.1
= control target key start
LH: loop header
LB: loop body
LE: loop exit
PB: predicated region body
PF: predicated region fallthrough
CT: control target
= control target key end

     0   :  { %s139_s0 = inlined_call_operand.vmem [shape: f32[16,128], index: 0, kind: input, shape index: {}]   ;;  %s140_s1 = inlined_call_operand.vmem [shape: f32[16,128], index: 1, kind: input, shape index: {}]   ;;  %s141_s2 = inlined_call_operand.vmem [shape: f32[8,128], index: 2, kind: output, shape index: {}]  }
   0x1   :  { %v80_v0 = vld [vmem:[%s139_s0] sm:$0xff]  ;;  %v81_v1 = vld [vmem:[%s139_s0 + $0x8] sm:$0xff] }
   0x2   :  { %v82_v2 = vld [vmem:[%s140_s1] sm:$0xff]  ;;  %v83_v3 = vld [vmem:[%s140_s1 + $0x8] sm:$0xff] }
   0x3   :  { %v84_v4 = vsub.f32 %v80_v0, %v82_v2  ;;  %v85_v5 = vsub.f32 %v81_v1, %v83_v3 }
   0x5   :  { %v86_v6 = vmul.f32 %v84_v4, %v84_v4  ;;  %v87_v7 = vmul.f32 %v85_v5, %v85_v5 }
   0x7   :  { %v88_v8 = vadd.f32 %v87_v7, %v86_v6 }
   0x9   :  { %91 = vst [vmem:[%s141_s2] sm:$0xff] %v88_v8 }

</bundles_post_ra>
